<compile_context>
chip_gen: v6e
topology: v6e:2x2x1
jax: 0.10.0
libtpu: 0.0.40
codegen_flags: <defaults>
</compile_context>

<pallas_src>
import functools

import jax
import jax.numpy as jnp
from jax import lax
from jax.experimental import pallas as pl
from jax.experimental.pallas import tpu as pltpu


def _l2_norm_kernel(x_ref, o_ref):
    # x_ref / o_ref: (TM, Dp) tiles in VMEM.
    x = x_ref[...].astype(jnp.float32)
    ssq = jnp.sum(x * x, axis=1, keepdims=True)          # (TM, 1)
    inv = lax.rsqrt(ssq + 1e-10)                          # 1/sqrt(sum + eps)
    o_ref[...] = (x * inv).astype(o_ref.dtype)


def _round_up(v, m):
    return (v + m - 1) // m * m


@functools.partial(jax.jit, static_argnames=("block_rows",))
def l2_norm(x, block_rows=256):
    """x: [B, D] -> x / sqrt(sum(x**2, axis=1) + 1e-10)[:, None]."""
    b, d = x.shape

    # Lane-dense padding: feature dim -> multiple of 128, rows -> multiple of
    # the row tile (zero rows/cols are exact for L2 norm and sliced off below).
    tm = min(block_rows, _round_up(b, 8))
    bp = _round_up(b, tm)
    dp = _round_up(d, 128)

    xp = x
    if (bp, dp) != (b, d):
        xp = jnp.pad(x, ((0, bp - b), (0, dp - d)))

    grid = bp // tm
    out = pl.pallas_call(
        _l2_norm_kernel,
        out_shape=jax.ShapeDtypeStruct((bp, dp), x.dtype),
        grid_spec=pltpu.PrefetchScalarGridSpec(
            num_scalar_prefetch=0,
            grid=(grid,),
            in_specs=[pl.BlockSpec((tm, dp), lambda i: (i, 0))],
            out_specs=pl.BlockSpec((tm, dp), lambda i: (i, 0)),
        ),
        compiler_params=pltpu.CompilerParams(
            dimension_semantics=("parallel",)),
    )(xp)

    return out[:b, :d]


def _reference(x):
    norm_x = jnp.sqrt((x ** 2).sum(1) + 1e-10)
    return x / norm_x[:, None]


if __name__ == "__main__":
    b, d = 64, 16  # module spec is B x D; small, unaligned D exercises padding

    key = jax.random.PRNGKey(0)
    x = jax.random.normal(key, (b, d), jnp.float32)

    out = jax.block_until_ready(l2_norm(x))

    ref = _reference(x)
    assert out.shape == (b, d)
    assert jnp.allclose(out, ref, atol=1e-4, rtol=1e-4)

    print("KERNEL_OK")
</pallas_src>

<mosaic_0001>
module attributes {stable_mosaic.version = 11 : i64} {
  func.func @_l2_norm_kernel(%arg0: i32, %arg1: memref<64x128xf32, #tpu.memory_space<vmem>>, %arg2: memref<64x128xf32, #tpu.memory_space<vmem>>) attributes {dimension_semantics = [#tpu.dimension_semantics<parallel>], iteration_bounds = array<i64: 1>, scalar_prefetch = 0 : i64, scratch_operands = 0 : i64, tpu.core_type = #tpu.core_type<tc>, window_params = [{transform_indices = @transform_0, window_bounds = array<i64: 64, 128>}, {transform_indices = @transform_1, window_bounds = array<i64: 64, 128>}]} {
    %c0 = arith.constant 0 : index
    %c0_0 = arith.constant 0 : index
    %0 = vector.load %arg1[%c0, %c0_0] : memref<64x128xf32, #tpu.memory_space<vmem>>, vector<64x128xf32>
    %1 = arith.mulf %0, %0 : vector<64x128xf32>
    %cst = arith.constant dense<0.000000e+00> : vector<64xf32>
    %2 = vector.multi_reduction <add>, %1, %cst [1] : vector<64x128xf32> to vector<64xf32>
    %3 = vector.shape_cast %2 : vector<64xf32> to vector<64x1xf32>
    %cst_1 = arith.constant 1.000000e-10 : f32
    %4 = vector.broadcast %cst_1 : f32 to vector<64x1xf32>
    %5 = arith.addf %3, %4 : vector<64x1xf32>
    %6 = math.rsqrt %5 : vector<64x1xf32>
    %7 = vector.broadcast %6 : vector<64x1xf32> to vector<64x128xf32>
    %8 = arith.mulf %0, %7 : vector<64x128xf32>
    %c0_2 = arith.constant 0 : index
    %c0_3 = arith.constant 0 : index
    %9 = vector.load %arg2[%c0_2, %c0_3] : memref<64x128xf32, #tpu.memory_space<vmem>>, vector<64x128xf32>
    tpu.vector_store %arg2[%c0_2, %c0_3], %8 {strides = array<i32>} : memref<64x128xf32, #tpu.memory_space<vmem>>, vector<64x128xf32>,
    return
  }
  func.func @transform_0(%arg0: i32) -> (i32, i32) {
    %c0_i32 = arith.constant 0 : i32
    %c0_i32_0 = arith.constant 0 : i32
    return %arg0, %c0_i32 : i32, i32
  }
  func.func @transform_1(%arg0: i32) -> (i32, i32) {
    %c0_i32 = arith.constant 0 : i32
    %c0_i32_0 = arith.constant 0 : i32
    return %arg0, %c0_i32 : i32, i32
  }
}

</mosaic_0001>

<bundles_post_ra>
// kernel: l2_norm.1
= control target key start
LH: loop header
LB: loop body
LE: loop exit
PB: predicated region body
PF: predicated region fallthrough
CT: control target
= control target key end

     0   :  { %s150_s0 = inlined_call_operand.vmem [shape: f32[64,128], index: 0, kind: input, shape index: {}]   ;;  %s151_s1 = inlined_call_operand.vmem [shape: f32[64,128], index: 1, kind: output, shape index: {}]  }
   0x1   :  { %v10_v0 = vld [vmem:[%s150_s0 + $0x10] sm:$0xff]  ;;  %v8_v1 = vld [vmem:[%s150_s0] sm:$0xff]  ;;  %v11_v2 = vld [vmem:[%s150_s0 + $0x18] sm:$0xff] }
   0x2   :  { %v18_v3 = vmul.f32 %v10_v0, %v10_v0  ;;  %v16_v4 = vmul.f32 %v8_v1, %v8_v1  ;;  %v9_v5 = vld [vmem:[%s150_s0 + $0x8] sm:$0xff]  ;;  %v19_v6 = vmul.f32 %v11_v2, %v11_v2  ;;  %v12_v9 = vld [vmem:[%s150_s0 + $0x20] sm:$0xff]  ;;  %v15_v12 = vld [vmem:[%s150_s0 + $0x38] sm:$0xff] }
   0x3   :  { %v17_v7 = vmul.f32 %v9_v5, %v9_v5  ;;  %v13_v8 = vld [vmem:[%s150_s0 + $0x28] sm:$0xff]  ;;  %v20_v11 = vmul.f32 %v12_v9, %v12_v9  ;;  %v14_v13 = vld [vmem:[%s150_s0 + $0x30] sm:$0xff]  ;;  %v23_v14 = vmul.f32 %v15_v12, %v15_v12 }
   0x4   :  { %28 = vadd.xlane.f32.xlu1 %v18_v3  ;;  %24 = vadd.xlane.f32.xlu0 %v16_v4  ;;  %v21_v10 = vmul.f32 %v13_v8, %v13_v8  ;;  %v22_v15 = vmul.f32 %v14_v13, %v14_v13 }
   0x8   :  { %30 = vadd.xlane.f32.xlu1 %v19_v6  ;;  %26 = vadd.xlane.f32.xlu0 %v17_v7 }
   0xc   :  { %34 = vadd.xlane.f32.xlu1 %v21_v10  ;;  %32 = vadd.xlane.f32.xlu0 %v20_v11 }
  0x10   :  { %38 = vadd.xlane.f32.xlu1 %v23_v14  ;;  %36 = vadd.xlane.f32.xlu0 %v22_v15 }
  0x8d   :  { %v29_v16 = vpop.xlane.xlu1 %28  ;;  %v25_v17 = vpop.xlane.xlu0 %24 }
  0x8e   :  { %v42_v18 = vadd.f32 1e-10, %v29_v16  ;;  %v40_v19 = vadd.f32 1e-10, %v25_v17 }
  0x90   :  { %76 = vrsqrt.f32 %v42_v18 }
  0x91   :  { %78 = vrsqrt.f32 %v40_v19  ;;  %v31_v20 = vpop.xlane.xlu1 %30  ;;  %v27_v21 = vpop.xlane.xlu0 %26 }
  0x92   :  { %v43_v22 = vadd.f32 1e-10, %v31_v20  ;;  %v41_v23 = vadd.f32 1e-10, %v27_v21 }
  0x94   :  { %80 = vrsqrt.f32 %v43_v22 }
  0x95   :  { %82 = vrsqrt.f32 %v41_v23  ;;  %v35_v24 = vpop.xlane.xlu1 %34  ;;  %v33_v25 = vpop.xlane.xlu0 %32 }
  0x96   :  { %v45_v26 = vadd.f32 1e-10, %v35_v24  ;;  %v44_v27 = vadd.f32 1e-10, %v33_v25 }
  0x98   :  { %84 = vrsqrt.f32 %v45_v26 }
  0x99   :  { %86 = vrsqrt.f32 %v44_v27  ;;  %v39_v28 = vpop.xlane.xlu1 %38  ;;  %v37_v29 = vpop.xlane.xlu0 %36 }
  0x9a   :  { %v47_v30 = vadd.f32 1e-10, %v39_v28  ;;  %v46_v31 = vadd.f32 1e-10, %v37_v29 }
  0x9c   :  { %88 = vrsqrt.f32 %v47_v30 }
  0x9d   :  { %v77_v32 = vpop.eup %76  ;;  %90 = vrsqrt.f32 %v46_v31 }
  0x9e   :  { %v79_v33 = vpop.eup %78  ;;  %v58_v34 = vmul.f32 %v77_v32, %v10_v0 }
  0x9f   :  { %v56_v35 = vmul.f32 %v79_v33, %v8_v1 }
  0xa0   :  { %66 = vst [vmem:[%s151_s1 + $0x10] sm:$0xff] %v58_v34 }
  0xa1   :  { %v81_v36 = vpop.eup %80  ;;  %64 = vst [vmem:[%s151_s1] sm:$0xff] %v56_v35 }
  0xa2   :  { %v83_v37 = vpop.eup %82  ;;  %v59_v38 = vmul.f32 %v81_v36, %v11_v2 }
  0xa3   :  { %v57_v39 = vmul.f32 %v83_v37, %v9_v5 }
  0xa4   :  { %67 = vst [vmem:[%s151_s1 + $0x18] sm:$0xff] %v59_v38 }
  0xa5   :  { %v85_v40 = vpop.eup %84  ;;  %65 = vst [vmem:[%s151_s1 + $0x8] sm:$0xff] %v57_v39 }
  0xa6   :  { %v87_v41 = vpop.eup %86  ;;  %v61_v42 = vmul.f32 %v85_v40, %v13_v8 }
  0xa7   :  { %v60_v43 = vmul.f32 %v87_v41, %v12_v9 }
  0xa8   :  { %69 = vst [vmem:[%s151_s1 + $0x28] sm:$0xff] %v61_v42 }
  0xa9   :  { %v89_v44 = vpop.eup %88  ;;  %68 = vst [vmem:[%s151_s1 + $0x20] sm:$0xff] %v60_v43 }
  0xaa   :  { %v91_v45 = vpop.eup %90  ;;  %v63_v46 = vmul.f32 %v89_v44, %v15_v12 }
  0xab   :  { %v62_v47 = vmul.f32 %v91_v45, %v14_v13 }
  0xac   :  { %71 = vst [vmem:[%s151_s1 + $0x38] sm:$0xff] %v63_v46 }
  0xad   :  { %70 = vst [vmem:[%s151_s1 + $0x30] sm:$0xff] %v62_v47 }

</bundles_post_ra>
